<compile_context>
chip_gen: v7x
topology: tpu7x:2x2x1
jax: 0.10.0
libtpu: 0.0.40
codegen_flags: <defaults>
</compile_context>

<pallas_src>
import math

import jax
import jax.numpy as jnp
from jax import lax
from jax.experimental import pallas as pl
from jax.experimental.pallas import tpu as pltpu

NUM_CLASSES = 2
FEAT_DIM = 128
MIN_DISTANCE = 1.0
REPULSION_STRENGTH = 1.0


def _center_loss_kernel(x_ref, ct_ref, cn_ref, labels_ref, sum_ref, aux_ref):
    """Per (shard, batch-tile) step: accumulate per-class partial statistics.

    Outputs (per shard, resident across the inner 'arbitrary' axis):
      sum_ref [C, D] : per-class feature sums           (mask^T @ x)
      aux_ref [C, 3] : [count | sum ||x||^2 | sum dist-to-own-center]
    """
    step = pl.program_id(1)

    @pl.when(step == 0)
    def _init():
        sum_ref[...] = jnp.zeros_like(sum_ref)
        aux_ref[...] = jnp.zeros_like(aux_ref)

    x = x_ref[...].astype(jnp.float32)   # [tb, D]  (bf16 on the wire -> f32 in VMEM)
    ct = ct_ref[...]                     # [D, C]   f32 centers^T (resident)
    c_norm_row = cn_ref[...]             # [1, C]   f32 (hoisted, loop-invariant)
    labels = labels_ref[...]             # [tb, 1]  int32 (-1 for padded rows)
    tb = x.shape[0]
    C = ct.shape[1]

    # ---- sample <-> center squared distances (natural MXU orientation) ----
    x_norm = jnp.sum(x * x, axis=1, keepdims=True)                # [tb, 1]
    xc = jnp.dot(x, ct, preferred_element_type=jnp.float32)       # [tb, C]
    dist2 = x_norm + c_norm_row - 2.0 * xc                        # [tb, C] VPU broadcast add

    classes = lax.broadcasted_iota(jnp.int32, (tb, C), 1)
    mask = (labels == classes).astype(jnp.float32)                # one-hot; all-zero for pads
    row_valid = jnp.sum(mask, axis=1, keepdims=True)              # 1.0 real row, 0.0 padded

    # ---- attraction term folded into the aux matmul ----
    sel2 = jnp.sum(mask * dist2, axis=1, keepdims=True)           # [tb, 1] dist^2 to own center
    sel = row_valid * jnp.sqrt(jnp.maximum(sel2, 1e-12))          # [tb, 1] (B sqrts, not B*C)

    # ---- per-class running sums: contract the batch dim on the MXU ----
    # sum_per_class += mask^T @ x                                   [C, D]
    sum_ref[...] += lax.dot_general(
        mask, x, (((0,), (0,)), ((), ())), preferred_element_type=jnp.float32)
    # fused aux: mask^T @ [1 | ||x||^2 | dist]  ->  [C, 3]
    lane = lax.broadcasted_iota(jnp.int32, (tb, 3), 1)
    aux_rhs = jnp.where(lane == 0, 1.0, jnp.where(lane == 1, x_norm, sel))
    aux_ref[...] += lax.dot_general(
        mask, aux_rhs, (((0,), (0,)), ((), ())), preferred_element_type=jnp.float32)


def _repulsion_loss(centers):
    """Center <-> center repulsion. Depends only on `centers`; plain JAX (hoisted)."""
    C = centers.shape[0]
    cn = jnp.sum(centers * centers, axis=1, keepdims=True)
    cd2 = cn + cn.T - 2.0 * centers @ centers.T
    cd = jnp.sqrt(jnp.maximum(cd2, 1e-12))
    off_diag = 1.0 - jnp.eye(C, dtype=centers.dtype)
    rep = jnp.maximum(MIN_DISTANCE - cd, 0.0)
    return jnp.sum(rep * off_diag) / (C * (C - 1) + 1e-6)


def center_loss(x, centers, labels, *, block_b=4096, n_shards=2):
    centers = centers.astype(jnp.float32)
    if x.dtype != jnp.bfloat16:          # bf16 streams as-is; everything else -> f32
        x = x.astype(jnp.float32)
    B, D = x.shape
    C = centers.shape[0]

    # ---- tiling: big batch tiles (DMA amortization), sharded across TCs ----
    num_tiles = max(1, pl.cdiv(B, block_b))
    shards = n_shards if num_tiles >= n_shards else 1
    num_tiles = pl.cdiv(num_tiles, shards) * shards      # multiple of `shards`
    tb = pl.cdiv(B, num_tiles)
    tb = max(8, ((tb + 7) // 8) * 8)                     # multiple of 8 sublanes
    b_pad = num_tiles * tb
    pad = b_pad - B
    steps = num_tiles // shards                          # inner 'arbitrary' axis length

    labels2d = labels.reshape(B, 1).astype(jnp.int32)
    if pad:
        x = jnp.pad(x, ((0, pad), (0, 0)))
        labels2d = jnp.pad(labels2d, ((0, pad), (0, 0)), constant_values=-1)

    ct = centers.T                                        # [D, C] natural MXU orientation
    c_norm = jnp.sum(centers * centers, axis=1).reshape(1, C)   # hoisted center norms

    sums, aux = pl.pallas_call(
        _center_loss_kernel,
        out_shape=(
            jax.ShapeDtypeStruct((shards, C, D), jnp.float32),   # per-shard feature sums
            jax.ShapeDtypeStruct((shards, C, 3), jnp.float32),   # per-shard [n, sum||x||^2, attr]
        ),
        grid=(shards, steps),
        in_specs=[
            pl.BlockSpec((tb, D), lambda s, i: (s * steps + i, 0)),   # x tile (pipelined)
            pl.BlockSpec((D, C), lambda s, i: (0, 0)),                # centers^T, resident
            pl.BlockSpec((1, C), lambda s, i: (0, 0)),                # center norms, resident
            pl.BlockSpec((tb, 1), lambda s, i: (s * steps + i, 0)),   # labels tile
        ],
        out_specs=(
            pl.BlockSpec((None, C, D), lambda s, i: (s, 0, 0)),       # accumulator per shard
            pl.BlockSpec((None, C, 3), lambda s, i: (s, 0, 0)),
        ),
        compiler_params=pltpu.CompilerParams(
            dimension_semantics=("parallel", "arbitrary")),
    )(x, ct, c_norm, labels2d)

    # ---- tiny finalize in plain JAX (moved out of the kernel) ----
    sums = jnp.sum(sums, axis=0)                # [C, D]
    aux = jnp.sum(aux, axis=0)                  # [C, 3]
    counts = aux[:, 0]
    sq = aux[:, 1]
    attraction = jnp.sum(aux[:, 2]) / B
    safe = jnp.maximum(counts, 1.0)
    mu = sums / safe[:, None]                   # class means
    mu_norm = jnp.sum(mu * mu, axis=1)
    # sum_i ||x_i - mu||^2 == sum_i ||x_i||^2 - n * ||mu||^2 ; clamp vs f32 cancellation
    var_c = jnp.maximum(sq - safe * mu_norm, 0.0) / safe
    intra = jnp.sum(jnp.where(counts > 1.0, var_c, 0.0)) / C

    total = attraction + REPULSION_STRENGTH * _repulsion_loss(centers) - 0.1 * intra
    # TODO(synk): the PyTorch module's no_grad diagnostics (avg_center_dist,
    # avg_sample_dist, center_attraction, ...) are side attributes, not outputs;
    # not reproduced here.
    return total


def center_loss_ref(x, centers, labels):
    """Pure-JAX reference mirroring the PyTorch module."""
    B, C = x.shape[0], centers.shape[0]
    xn = jnp.sum(x ** 2, 1, keepdims=True)
    cn = jnp.sum(centers ** 2, 1, keepdims=True)
    distmat = jnp.sqrt(jnp.maximum(xn + cn.T - 2.0 * x @ centers.T, 1e-12))
    mask = (labels[:, None] == jnp.arange(C)[None, :]).astype(jnp.float32)
    attraction = jnp.sum(distmat * mask) / B
    cd = jnp.sqrt(jnp.maximum(cn + cn.T - 2.0 * centers @ centers.T, 1e-12))
    dm = 1.0 - jnp.eye(C)
    rep = jnp.sum(jnp.maximum(MIN_DISTANCE - cd, 0.0) * dm) / (C * (C - 1) + 1e-6)
    intra = 0.0
    for cls in range(C):
        m = (labels == cls).astype(jnp.float32)
        n = jnp.sum(m)
        mu = jnp.sum(x * m[:, None], 0) / jnp.maximum(n, 1.0)
        var = jnp.sum(jnp.sum((x - mu) ** 2, 1) * m) / jnp.maximum(n, 1.0)
        intra = intra + jnp.where(n > 1, var, 0.0)
    intra = intra / C
    return attraction + REPULSION_STRENGTH * rep - 0.1 * intra


if __name__ == "__main__":
    key = jax.random.PRNGKey(0)

    # Deterministic centers init matching the module's __init__ for num_classes == 2.
    inv = 1.0 / math.sqrt(FEAT_DIM)
    centers = jnp.stack([
        -jnp.ones((FEAT_DIM,), jnp.float32) * inv,
        jnp.ones((FEAT_DIM,), jnp.float32) * inv,
    ])

    kx, kl, kx2, kl2 = jax.random.split(key, 4)

    # Small case: single shard, single step.
    B = 8
    x = jax.random.normal(kx, (B, FEAT_DIM), jnp.float32)
    labels = jax.random.randint(kl, (B,), 0, NUM_CLASSES, jnp.int32)
    loss = center_loss(x, centers, labels)
    jax.block_until_ready(loss)
    ref = center_loss_ref(x, centers, labels)
    assert abs(float(loss) - float(ref)) < 1e-4, (float(loss), float(ref))

    # Exercise padding + the 2-shard "parallel" axis + multi-step accumulators
    # (block_b forced small so grid=(2, 2)).
    B2 = 250
    x2 = jax.random.normal(kx2, (B2, FEAT_DIM), jnp.float32)
    labels2 = jax.random.randint(kl2, (B2,), 0, NUM_CLASSES, jnp.int32)
    loss2 = center_loss(x2, centers, labels2, block_b=64)
    jax.block_until_ready(loss2)
    ref2 = center_loss_ref(x2, centers, labels2)
    assert abs(float(loss2) - float(ref2)) < 1e-3, (float(loss2), float(ref2))

    # Default large-tile path on the same data (grid=(1, 1)).
    loss3 = center_loss(x2, centers, labels2)
    jax.block_until_ready(loss3)
    assert abs(float(loss3) - float(ref2)) < 1e-3, (float(loss3), float(ref2))

    # bf16 feature streaming: half the HBM bytes; math is f32 after in-VMEM upcast.
    x2_bf16 = x2.astype(jnp.bfloat16)
    loss4 = center_loss(x2_bf16, centers, labels2)
    jax.block_until_ready(loss4)
    ref4 = center_loss_ref(x2_bf16.astype(jnp.float32), centers, labels2)
    assert abs(float(loss4) - float(ref4)) < 1e-3, (float(loss4), float(ref4))

    print("KERNEL_OK")
</pallas_src>

<mosaic_0001>
module attributes {stable_mosaic.version = 11 : i64} {
  func.func @_center_loss_kernel(%arg0: i32, %arg1: i32, %arg2: memref<8x128xf32, #tpu.memory_space<vmem>>, %arg3: memref<128x2xf32, #tpu.memory_space<vmem>>, %arg4: memref<1x2xf32, #tpu.memory_space<vmem>>, %arg5: memref<8x1xi32, #tpu.memory_space<vmem>>, %arg6: memref<1x2x128xf32, #tpu.memory_space<vmem>>, %arg7: memref<1x2x3xf32, #tpu.memory_space<vmem>>) attributes {dimension_semantics = [#tpu.dimension_semantics<parallel>, #tpu.dimension_semantics<arbitrary>], iteration_bounds = array<i64: 1, 1>, scalar_prefetch = 0 : i64, scratch_operands = 0 : i64, tpu.core_type = #tpu.core_type<tc>, window_params = [{transform_indices = @transform_0, window_bounds = array<i64: 8, 128>}, {pipeline_mode = #tpu.pipeline_mode<synchronous>, transform_indices = @transform_1, window_bounds = array<i64: 128, 2>}, {pipeline_mode = #tpu.pipeline_mode<synchronous>, transform_indices = @transform_2, window_bounds = array<i64: 1, 2>}, {transform_indices = @transform_3, window_bounds = array<i64: 8, 1>}, {transform_indices = @transform_4, window_bounds = array<i64: 1, 2, 128>}, {transform_indices = @transform_5, window_bounds = array<i64: 1, 2, 3>}]} {
    %c0_i32 = arith.constant 0 : i32
    %0 = arith.cmpi eq, %arg1, %c0_i32 : i32
    %1 = arith.extui %0 : i1 to i32
    %c0_i32_0 = arith.constant 0 : i32
    %2 = arith.cmpi ne, %1, %c0_i32_0 : i32
    scf.if %2 {
      %cst_29 = arith.constant 0.000000e+00 : f32
      %57 = vector.broadcast %cst_29 : f32 to vector<2x128xf32>
      %c0_30 = arith.constant 0 : index
      %c0_31 = arith.constant 0 : index
      %c0_32 = arith.constant 0 : index
      %58 = vector.load %arg6[%c0_30, %c0_31, %c0_32] : memref<1x2x128xf32, #tpu.memory_space<vmem>>, vector<1x2x128xf32>
      %59 = vector.shape_cast %58 : vector<1x2x128xf32> to vector<2x128xf32>
      %60 = vector.shape_cast %57 : vector<2x128xf32> to vector<1x2x128xf32>
      tpu.vector_store %arg6[%c0_30, %c0_31, %c0_32], %60 {strides = array<i32>} : memref<1x2x128xf32, #tpu.memory_space<vmem>>, vector<1x2x128xf32>,
      %cst_33 = arith.constant 0.000000e+00 : f32
      %61 = vector.broadcast %cst_33 : f32 to vector<2x3xf32>
      %c0_34 = arith.constant 0 : index
      %c0_35 = arith.constant 0 : index
      %c0_36 = arith.constant 0 : index
      %62 = vector.load %arg7[%c0_34, %c0_35, %c0_36] : memref<1x2x3xf32, #tpu.memory_space<vmem>>, vector<1x2x3xf32>
      %63 = vector.shape_cast %62 : vector<1x2x3xf32> to vector<2x3xf32>
      %64 = vector.shape_cast %61 : vector<2x3xf32> to vector<1x2x3xf32>
      tpu.vector_store %arg7[%c0_34, %c0_35, %c0_36], %64 {strides = array<i32>} : memref<1x2x3xf32, #tpu.memory_space<vmem>>, vector<1x2x3xf32>,
    } else {
    }
    %c0 = arith.constant 0 : index
    %c0_1 = arith.constant 0 : index
    %3 = vector.load %arg2[%c0, %c0_1] : memref<8x128xf32, #tpu.memory_space<vmem>>, vector<8x128xf32>
    %c0_2 = arith.constant 0 : index
    %c0_3 = arith.constant 0 : index
    %4 = vector.load %arg3[%c0_2, %c0_3] : memref<128x2xf32, #tpu.memory_space<vmem>>, vector<128x2xf32>
    %c0_4 = arith.constant 0 : index
    %c0_5 = arith.constant 0 : index
    %5 = vector.load %arg4[%c0_4, %c0_5] : memref<1x2xf32, #tpu.memory_space<vmem>>, vector<1x2xf32>
    %c0_6 = arith.constant 0 : index
    %c0_7 = arith.constant 0 : index
    %6 = vector.load %arg5[%c0_6, %c0_7] : memref<8x1xi32, #tpu.memory_space<vmem>>, vector<8x1xi32>
    %7 = arith.mulf %3, %3 : vector<8x128xf32>
    %cst = arith.constant dense<0.000000e+00> : vector<8xf32>
    %8 = vector.multi_reduction <add>, %7, %cst [1] : vector<8x128xf32> to vector<8xf32>
    %9 = vector.shape_cast %8 : vector<8xf32> to vector<8x1xf32>
    %cst_8 = arith.constant dense<0.000000e+00> : vector<8x2xf32>
    %10 = tpu.matmul %3, %4, %cst_8 {dimension_numbers = #tpu.dot_dimension_numbers<[1], [0], [0], [1], [0, 0, 1, 1], [], []>} : vector<8x128xf32>, vector<128x2xf32>, vector<8x2xf32> -> vector<8x2xf32>
    %11 = vector.broadcast %9 : vector<8x1xf32> to vector<8x2xf32>
    %12 = vector.broadcast %5 : vector<1x2xf32> to vector<8x2xf32>
    %13 = arith.addf %11, %12 : vector<8x2xf32>
    %cst_9 = arith.constant 2.000000e+00 : f32
    %14 = vector.broadcast %cst_9 : f32 to vector<8x2xf32>
    %15 = arith.mulf %14, %10 : vector<8x2xf32>
    %16 = arith.subf %13, %15 : vector<8x2xf32>
    %17 = tpu.iota {dimensions = array<i32: 1>} : vector<8x2xi32>
    %18 = vector.broadcast %6 : vector<8x1xi32> to vector<8x2xi32>
    %19 = arith.cmpi eq, %18, %17 : vector<8x2xi32>
    %20 = arith.extui %19 : vector<8x2xi1> to vector<8x2xi32>
    %21 = arith.sitofp %20 : vector<8x2xi32> to vector<8x2xf32>
    %cst_10 = arith.constant dense<0.000000e+00> : vector<8xf32>
    %22 = vector.multi_reduction <add>, %21, %cst_10 [1] : vector<8x2xf32> to vector<8xf32>
    %23 = vector.shape_cast %22 : vector<8xf32> to vector<8x1xf32>
    %24 = arith.mulf %21, %16 : vector<8x2xf32>
    %cst_11 = arith.constant dense<0.000000e+00> : vector<8xf32>
    %25 = vector.multi_reduction <add>, %24, %cst_11 [1] : vector<8x2xf32> to vector<8xf32>
    %26 = vector.shape_cast %25 : vector<8xf32> to vector<8x1xf32>
    %cst_12 = arith.constant 9.99999996E-13 : f32
    %27 = vector.broadcast %cst_12 : f32 to vector<8x1xf32>
    %28 = arith.maximumf %26, %27 : vector<8x1xf32>
    %29 = math.sqrt %28 : vector<8x1xf32>
    %30 = arith.mulf %23, %29 : vector<8x1xf32>
    %c0_13 = arith.constant 0 : index
    %c0_14 = arith.constant 0 : index
    %c0_15 = arith.constant 0 : index
    %31 = vector.load %arg6[%c0_13, %c0_14, %c0_15] : memref<1x2x128xf32, #tpu.memory_space<vmem>>, vector<1x2x128xf32>
    %32 = vector.shape_cast %31 : vector<1x2x128xf32> to vector<2x128xf32>
    %cst_16 = arith.constant dense<0.000000e+00> : vector<2x128xf32>
    %33 = tpu.matmul %21, %3, %cst_16 {dimension_numbers = #tpu.dot_dimension_numbers<[0], [0], [1], [1], [0, 1, 1, 1], [], []>} : vector<8x2xf32>, vector<8x128xf32>, vector<2x128xf32> -> vector<2x128xf32>
    %34 = arith.addf %32, %33 : vector<2x128xf32>
    %c0_17 = arith.constant 0 : index
    %c0_18 = arith.constant 0 : index
    %c0_19 = arith.constant 0 : index
    %35 = vector.load %arg6[%c0_17, %c0_18, %c0_19] : memref<1x2x128xf32, #tpu.memory_space<vmem>>, vector<1x2x128xf32>
    %36 = vector.shape_cast %35 : vector<1x2x128xf32> to vector<2x128xf32>
    %37 = vector.shape_cast %34 : vector<2x128xf32> to vector<1x2x128xf32>
    tpu.vector_store %arg6[%c0_17, %c0_18, %c0_19], %37 {strides = array<i32>} : memref<1x2x128xf32, #tpu.memory_space<vmem>>, vector<1x2x128xf32>,
    %38 = tpu.iota {dimensions = array<i32: 1>} : vector<8x3xi32>
    %c0_i32_20 = arith.constant 0 : i32
    %39 = vector.broadcast %c0_i32_20 : i32 to vector<8x3xi32>
    %40 = arith.cmpi eq, %38, %39 : vector<8x3xi32>
    %c1_i32 = arith.constant 1 : i32
    %41 = vector.broadcast %c1_i32 : i32 to vector<8x3xi32>
    %42 = arith.cmpi eq, %38, %41 : vector<8x3xi32>
    %43 = vector.shape_cast %9 : vector<8x1xf32> to vector<8x1xf32>
    %44 = vector.broadcast %43 : vector<8x1xf32> to vector<8x3xf32>
    %45 = vector.shape_cast %30 : vector<8x1xf32> to vector<8x1xf32>
    %46 = vector.broadcast %45 : vector<8x1xf32> to vector<8x3xf32>
    %47 = arith.select %42, %44, %46 : vector<8x3xi1>, vector<8x3xf32>
    %cst_21 = arith.constant 1.000000e+00 : f32
    %48 = vector.broadcast %cst_21 : f32 to vector<8x3xf32>
    %49 = arith.select %40, %48, %47 : vector<8x3xi1>, vector<8x3xf32>
    %c0_22 = arith.constant 0 : index
    %c0_23 = arith.constant 0 : index
    %c0_24 = arith.constant 0 : index
    %50 = vector.load %arg7[%c0_22, %c0_23, %c0_24] : memref<1x2x3xf32, #tpu.memory_space<vmem>>, vector<1x2x3xf32>
    %51 = vector.shape_cast %50 : vector<1x2x3xf32> to vector<2x3xf32>
    %cst_25 = arith.constant dense<0.000000e+00> : vector<2x3xf32>
    %52 = tpu.matmul %21, %49, %cst_25 {dimension_numbers = #tpu.dot_dimension_numbers<[0], [0], [1], [1], [0, 1, 1, 1], [], []>} : vector<8x2xf32>, vector<8x3xf32>, vector<2x3xf32> -> vector<2x3xf32>
    %53 = arith.addf %51, %52 : vector<2x3xf32>
    %c0_26 = arith.constant 0 : index
    %c0_27 = arith.constant 0 : index
    %c0_28 = arith.constant 0 : index
    %54 = vector.load %arg7[%c0_26, %c0_27, %c0_28] : memref<1x2x3xf32, #tpu.memory_space<vmem>>, vector<1x2x3xf32>
    %55 = vector.shape_cast %54 : vector<1x2x3xf32> to vector<2x3xf32>
    %56 = vector.shape_cast %53 : vector<2x3xf32> to vector<1x2x3xf32>
    tpu.vector_store %arg7[%c0_26, %c0_27, %c0_28], %56 {strides = array<i32>} : memref<1x2x3xf32, #tpu.memory_space<vmem>>, vector<1x2x3xf32>,
    return
  }
  func.func @transform_0(%arg0: i32, %arg1: i32) -> (i32, i32) {
    %c1_i32 = arith.constant 1 : i32
    %0 = arith.muli %arg0, %c1_i32 : i32
    %1 = arith.addi %0, %arg1 : i32
    %c0_i32 = arith.constant 0 : i32
    %c0_i32_0 = arith.constant 0 : i32
    return %1, %c0_i32 : i32, i32
  }
  func.func @transform_1(%arg0: i32, %arg1: i32) -> (i32, i32) {
    %c0_i32 = arith.constant 0 : i32
    %c0_i32_0 = arith.constant 0 : i32
    %c0_i32_1 = arith.constant 0 : i32
    return %c0_i32, %c0_i32_0 : i32, i32
  }
  func.func @transform_2(%arg0: i32, %arg1: i32) -> (i32, i32) {
    %c0_i32 = arith.constant 0 : i32
    %c0_i32_0 = arith.constant 0 : i32
    %c0_i32_1 = arith.constant 0 : i32
    return %c0_i32, %c0_i32_0 : i32, i32
  }
  func.func @transform_3(%arg0: i32, %arg1: i32) -> (i32, i32) {
    %c1_i32 = arith.constant 1 : i32
    %0 = arith.muli %arg0, %c1_i32 : i32
    %1 = arith.addi %0, %arg1 : i32
    %c0_i32 = arith.constant 0 : i32
    %c0_i32_0 = arith.constant 0 : i32
    return %1, %c0_i32 : i32, i32
  }
  func.func @transform_4(%arg0: i32, %arg1: i32) -> (i32, i32, i32) {
    %c0_i32 = arith.constant 0 : i32
    %c0_i32_0 = arith.constant 0 : i32
    %c0_i32_1 = arith.constant 0 : i32
    return %arg0, %c0_i32, %c0_i32_0 : i32, i32, i32
  }
  func.func @transform_5(%arg0: i32, %arg1: i32) -> (i32, i32, i32) {
    %c0_i32 = arith.constant 0 : i32
    %c0_i32_0 = arith.constant 0 : i32
    %c0_i32_1 = arith.constant 0 : i32
    return %arg0, %c0_i32, %c0_i32_0 : i32, i32, i32
  }
}

</mosaic_0001>

<bundles_post_ra>
// kernel: tpu_custom_call.1
= control target key start
LH: loop header
LB: loop body
LE: loop exit
PB: predicated region body
PF: predicated region fallthrough
CT: control target
= control target key end

     0   :  { %11 = vsyncpa [#allocation3], 0  ;;  %v566_v3 = vmov 0.0|0.0   ;;  %vm567_vm0 = vmmov 0   ;;  %v568_v6 = vmov 0.0   ;;  %v569_v7 = vmov 0   ;;  %s696_s0 = inlined_call_operand.vmem [shape: f32[8,128], index: 0, kind: input, shape index: {}]   ;;  %s697_s1 = inlined_call_operand.vmem [shape: f32[128,2], index: 1, kind: input, shape index: {}]   ;;  %s698_s2 = inlined_call_operand.vmem [shape: f32[1,2], index: 2, kind: input, shape index: {}]   ;;  %s699_s3 = inlined_call_operand.vmem [shape: s32[8,1], index: 3, kind: input, shape index: {}]   ;;  %s700_s4 = inlined_call_operand.hbm [shape: f32[1,2,128], index: 4, kind: output, shape index: {0}]   ;;  %s701_s5 = inlined_call_operand.hbm [shape: f32[1,2,3], index: 5, kind: output, shape index: {1}]  }
   0x1   :  { %v63_v0 = vld [vmem:[%s697_s1] sm:$0xff]  ;;  %v64_v1 = vld [vmem:[%s697_s1 + $0x8] sm:$0xff]  ;;  %v65_v2 = vld [vmem:[%s697_s1 + $0x10] sm:$0xff]  ;;  %485 = vmatprep.subr.bf16.mxu0 %v566_v3  ;;  %472 = vmatprep.mubr.msk.f32.mxu0 %vm567_vm0, %v568_v6  ;;  %59 = vst [vmem:[#allocation2] sm:$0x3] %v568_v6 }
   0x2   :  { %v486_v4 = vpack.c.bf16 %v64_v1, %v63_v0  ;;  %v66_v5 = vld [vmem:[%s697_s1 + $0x18] sm:$0xff]  ;;  %515 = vset.pattern.permute.xlu0 %v569_v7  ;;  %475 = vmatprep.subr.mxu1 %v568_v6  ;;  %v67_v9 = vld [vmem:[%s697_s1 + $0x20] sm:$0xff]  ;;  %v68_v10 = vld [vmem:[%s697_s1 + $0x28] sm:$0xff] }
   0x3   :  { %v489_v8 = vpack.c.bf16 %v66_v5, %v65_v2  ;;  %477 = vmatprep.mubr.msk.f32.mxu1 %vm567_vm0, %v568_v6  ;;  %v62_v11 = vld [vmem:[%s696_s0] sm:$0xff] }
   0x4   :  { %487 = vmatpush3.bf16.msra.mxu0 %v486_v4  ;;  %v81_v12 = vmul.f32 %v62_v11, %v62_v11  ;;  %476 = vmatpush3.msra.mxu1 %v62_v11 }
   0x5   :  { %488 = vmatprep.subr.bf16.mxu0 %v566_v3 }
   0x6   :  { %12 = vsyncpa [#allocation5], 0  ;;  %v492_v13 = vpack.c.bf16 %v68_v10, %v67_v9  ;;  %480 = vmatprep.subr.mxu1 %v568_v6  ;;  %v69_v14 = vld [vmem:[%s697_s1 + $0x30] sm:$0xff]  ;;  %v70_v15 = vld [vmem:[%s697_s1 + $0x38] sm:$0xff]  ;;  %82 = vadd.xlane.f32.xlu0 %v81_v12  ;;  %v163_v30 = vlaneseq  ;;  %vm171_vm2 = vcmask 15360   ;;  %vm221_vm6 = vcmask 64512  }
   0x7   :  { %v495_v16 = vpack.c.bf16 %v70_v15, %v69_v14  ;;  %v71_v17 = vld [vmem:[%s697_s1 + $0x40] sm:$0xff]  ;;  %v72_v18 = vld [vmem:[%s697_s1 + $0x48] sm:$0xff]  ;;  %v73_v20 = vld [vmem:[%s697_s1 + $0x50] sm:$0xff]  ;;  %vm60_vm8 = vcmask 17408  }
   0x8   :  { %490 = vmatpush3.bf16.msra.mxu0 %v489_v8  ;;  %v498_v19 = vpack.c.bf16 %v72_v18, %v71_v17  ;;  %v74_v21 = vld [vmem:[%s697_s1 + $0x58] sm:$0xff]  ;;  %v75_v23 = vld [vmem:[%s697_s1 + $0x60] sm:$0xff]  ;;  %v76_v24 = vld [vmem:[%s697_s1 + $0x68] sm:$0xff]  ;;  %v164_v32 = vand.u32 127, %v163_v30  ;;  %61 = vst.msk [vmem:[#allocation4] sm:$0x3] %vm60_vm8, %v568_v6 }
   0x9   :  { %491 = vmatprep.subr.bf16.mxu0 %v566_v3  ;;  %v501_v22 = vpack.c.bf16 %v74_v21, %v73_v20  ;;  %v504_v25 = vpack.c.bf16 %v76_v24, %v75_v23  ;;  %v77_v26 = vld [vmem:[%s697_s1 + $0x70] sm:$0xff]  ;;  %v78_v27 = vld [vmem:[%s697_s1 + $0x78] sm:$0xff]  ;;  %v80_v29 = vld [vmem:[%s699_s3] sm:$0xff]  ;;  %s570_s1 = smov [#allocation2]   ;;  %s571_s3 = smov [#allocation4]  }
   0xa   :  { %v507_v28 = vpack.c.bf16 %v78_v27, %v77_v26  ;;  %v415_v34 = vld [vmem:[%s698_s2] ss:$0 sm:$0xff]  ;;  %vm298_vm5 = vcmp.eq.s32.totalorder %v164_v32, 1  ;;  %vm297_vm7 = vcmp.eq.s32.totalorder %v164_v32, 0  ;;  %s381_s2 = sshll.u32 %s570_s1, 4  ;;  %s391_s30 = sshll.u32 %s571_s3, 4  ;;  %s382_s2 = int_to_ptr.vmem [resolvable:$true] %s381_s2  ;;  %s392_s30 = int_to_ptr.vmem [resolvable:$true] %s391_s30 }
   0xb   :  { %v188_v56 = vld [vmem:[#allocation2] sm:$0x3]  ;;  %s518_s6 = scalar_lea.vmem %s382_s2, 32  ;;  %p523_p1 = scmp.lt.s32.totalorder %s382_s2, %s382_s2 }
   0xc   :  { %493 = vmatpush3.bf16.msra.mxu0 %v492_v13  ;;  %p519_p0 = scmp.ne.s32.totalorder %s382_s2, %s518_s6  ;;  %p524_p2 = scmp.lt.s32.totalorder %s518_s6, %s518_s6 }
   0xd   :  { %494 = vmatprep.subr.bf16.mxu0 %v566_v3 }
   0xe   :  { %p525_p3 = por %p524_p2, %p523_p1 }
   0xf   :  { %v301_v60 = vld [vmem:[#allocation4] sm:$0x3] }
  0x10   :  { %496 = vmatpush3.bf16.msra.mxu0 %v495_v16  ;;  %p526_p4 = pnand %p525_p3, %p519_p0 }
  0x11   :  { %497 = vmatprep.subr.bf16.mxu0 %v566_v3 }
  0x14   :  { %499 = vmatpush3.bf16.msra.mxu0 %v498_v19 }
  0x15   :  { %500 = vmatprep.subr.bf16.mxu0 %v566_v3 }
  0x18   :  { %502 = vmatpush3.bf16.msra.mxu0 %v501_v22 }
  0x19   :  { %503 = vmatprep.subr.bf16.mxu0 %v566_v3 }
  0x1c   :  { %505 = vmatpush3.bf16.msra.mxu0 %v504_v25  ;;  %166 = vperm.xlu0 %515, %v80_v29  }
  0x1d   :  { %506 = vmatprep.subr.bf16.mxu0 %v566_v3 }
  0x20   :  { %508 = vmatpush3.bf16.msra.mxu0 %v507_v28 }
  0x23   :  { %473 = vmatmul.mubr.f32.vlgmr.msra.gmra.mrb[0].mxu0 %v62_v11 }
  0x93   :  { %v83_v31 = vpop.xlane.xlu0 %82 }
  0x94   :  { %v160_v36 = vadd.f32 %v415_v34, %v83_v31 }
  0x9b   :  { %v167_v33 = vpop.permute.xlu0 %166 }
  0x9c   :  { %vm168_vm1 = vcmp.eq.s32.totalorder %v167_v33, %v164_v32 }
  0x9d   :  { %v416_v39 = vsel %vm168_vm1, 1.0, %v568_v6 }
  0x9e   :  { %v172_v43 = vsel %vm171_vm2, %v416_v39, 0.0 }
  0xf6   :  { %v150_v35 = vpop.f32.mrb[0].mxu0 }
  0xf7   :  { %v161_v37 = vmul.f32 2.0, %v150_v35  ;;  %v474_v38 = vpop.f32.mrb[1].mxu0 }
  0xf9   :  { %v162_v40 = vsub.f32 %v160_v36, %v161_v37 }
  0xfb   :  { %v175_v41 = vmul.f32 %v416_v39, %v162_v40 }
  0xfd   :  { %v176_v42 = vsel %vm171_vm2, %v175_v41, 0.0 }
  0xfe   :  { %177 = vadd.xlane.f32.xlu1 %v176_v42 }
 0x102   :  { %173 = vadd.xlane.f32.xlu1 %v172_v43 }
 0x135   :  { %189 = vxpose.xlu1.b32.start.end [1/1] (short) (narrow) %v416_v39, 8 }
 0x18b   :  { %v178_v44 = vpop.xlane.xlu1 %177 }
 0x18c   :  { %v179_v45 = vmax.f32 %v178_v44, 1e-12 }
 0x18e   :  { %516 = vrsqrt.f32 %v179_v45  ;;  %vm182_vm3 = vcmp.eq.f32.partialorder %v179_v45, inf  ;;  %v185_v49 = vand.u32 2147483648, %v179_v45  ;;  %vm184_vm4 = vcmp.eq.f32.partialorder %v179_v45, 0.0 }
 0x18f   :  { %v174_v51 = vpop.xlane.xlu1 %173 }
 0x198   :  { %v517_v46 = vpop.eup %516 }
 0x199   :  { %v181_v47 = vmul.f32 %v517_v46, %v179_v45 }
 0x19b   :  { %v183_v48 = vsel %vm182_vm3, %v179_v45, %v181_v47 }
 0x19c   :  { %v186_v50 = vsel %vm184_vm4, %v185_v49, %v183_v48 }
 0x19d   :  { %v187_v52 = vmul.f32 %v186_v50, %v174_v51 }
 0x19f   :  { %v299_v53 = vsel %vm298_vm5, %v83_v31, %v187_v52 }
 0x1a0   :  { %v300_v55 = vsel %vm297_vm7, 1.0, %v299_v53 }
 0x1b5   :  { %v205_v54 = vpop.trf.xlu1 }
 0x1b6   :  { %478 = vmatmul.mubr.msk.f32.vlgmr.msra.gmra.mrb[0].mxu1 %vm221_vm6, %v205_v54 }
 0x1b7   :  { %481 = vmatpush3.msra.mxu1 %v300_v55  ;;  %482 = vmatprep.mubr.msk.f32.mxu1 %vm567_vm0, %v568_v6 }
 0x1ba   :  { %483 = vmatmul.mubr.msk.f32.vlgmr.msra.gmra.mrb[2].mxu1 %vm221_vm6, %v205_v54 }
 0x289   :  { %v291_v57 = vpop.f32.mrb[0].mxu1 }
 0x28a   :  { %v295_v58 = vadd.f32 %v291_v57, %v188_v56  ;;  %v479_v59 = vpop.f32.mrb[1].mxu1 }
 0x28c   :  { %296 = vst [vmem:[#allocation2] sm:$0x3] %v295_v58 }
 0x28d   :  { %v368_v61 = vpop.f32.mrb[2].mxu1 }
 0x28e   :  { %529 = shalt.err (!%p526_p4)
}
 0x28f   :  { %s530_s9 = scalar_lea.hbm %s700_s4, 32 }
 0x290   :  { %p531_p5 = scmp.ne.s32.totalorder %s700_s4, %s530_s9  ;;  %p534_p6 = scmp.lt.u32.totalorder %s530_s9, %s700_s4 }
 0x292   :  { %p536_p7 = pnand %p534_p6, %p531_p5 }
 0x294   :  { %539 = shalt.err (!%p536_p7)
}
 0x295   :  { %384 = dma.vmem_to_hbm [thread:$0]  %s382_s2, 32, %s700_s4, [#allocation3]   ;;  %v372_v62 = vadd.f32 %v368_v61, %v301_v60  ;;  %v484_v63 = vpop.f32.mrb[3].mxu1 }
 0x296   :  { %s540_s15 = scalar_lea.vmem %s392_s30, 32  ;;  %p545_p9 = scmp.lt.s32.totalorder %s392_s30, %s392_s30 }
 0x297   :  { %374 = vst.msk [vmem:[#allocation4] sm:$0x3] %vm60_vm8, %v372_v62  ;;  %p541_p8 = scmp.ne.s32.totalorder %s392_s30, %s540_s15  ;;  %p546_p10 = scmp.lt.s32.totalorder %s540_s15, %s540_s15 }
 0x299   :  { %p547_p11 = por %p546_p10, %p545_p9 }
 0x29b   :  { %p548_p12 = pnand %p547_p11, %p541_p8 }
 0x29d   :  { %551 = shalt.err (!%p548_p12)
}
 0x29e   :  { %s552_s18 = scalar_lea.hbm %s701_s5, 32 }
 0x29f   :  { %p553_p13 = scmp.ne.s32.totalorder %s701_s5, %s552_s18  ;;  %p556_p0 = scmp.lt.u32.totalorder %s552_s18, %s701_s5 }
 0x2a1   :  { %p558_p1 = pnand %p556_p0, %p553_p13 }
 0x2a3   :  { %561 = shalt.err (!%p558_p1)
}
 0x2a4   :  { %394 = dma.vmem_to_hbm [thread:$0]  %s392_s30, 32, %s701_s5, [#allocation5]  }
 0x2a5   :  { %562 = dma.done.wait [#allocation3], 32  }
 0x2a6   :  { %563 = vsyncadd [#allocation3], 4294967264 }
 0x2a7   :  { %564 = dma.done.wait [#allocation5], 32  }
 0x2a8   :  { %565 = vsyncadd [#allocation5], 4294967264 }
 0x2a9   :  { %401 = vsyncpa [#allocation3], 1 }
 0x2aa   :  { %402 = vsyncpa [#allocation5], 1 }

</bundles_post_ra>
